<compile_context>
chip_gen: v6e
topology: v6e:2x2x1
jax: 0.10.0
libtpu: 0.0.40
codegen_flags: <defaults>
</compile_context>

<pallas_src>
import jax
import jax.numpy as jnp
from jax.experimental import pallas as pl
from jax.experimental.pallas import tpu as pltpu


def _round_up(n: int, m: int) -> int:
    return ((n + m - 1) // m) * m


def _mlp_kernel(x_ref, w1_ref, b1_ref, w2_ref, b2_ref, o_ref):
    # Fused: hidden = relu(x @ W1 + b1); out = hidden @ W2 + b2
    # x/W1/W2 are bf16; accumulation is f32 on the MXU; biases are f32 rows
    # broadcast from (1, N) onto the f32 accumulator (no per-iter reshapes).
    x = x_ref[...]
    h = jnp.dot(x, w1_ref[...], preferred_element_type=jnp.float32) + b1_ref[...]
    h = jnp.maximum(h, 0.0).astype(jnp.bfloat16)
    o = jnp.dot(h, w2_ref[...], preferred_element_type=jnp.float32) + b2_ref[...]
    o_ref[...] = o.astype(o_ref.dtype)


def wrapped_model_forward(params, x, label=None, *, tm=128):
    """WrappedModel.forward: delegate to the (synthetic) inner module.

    `label` is accepted for signature parity and ignored (label=None path).
    """
    w1, b1, w2, b2 = params["w1"], params["b1"], params["w2"], params["b2"]
    batch, in_f = x.shape
    hid = w1.shape[1]
    out_f = w2.shape[1]

    # Pad every dim to MXU / lane friendly multiples (zero padding is inert:
    # zero K-columns contribute nothing; zero hidden cols have zero bias ->
    # relu(0)=0 -> zero contribution through W2; extra out cols are sliced off).
    in_p = _round_up(in_f, 128)
    hid_p = _round_up(hid, 128)
    out_p = _round_up(out_f, 128)
    tm = min(tm, _round_up(batch, 8))
    b_pad = _round_up(batch, tm)

    xb = jnp.pad(x, ((0, b_pad - batch), (0, in_p - in_f))).astype(jnp.bfloat16)
    w1p = jnp.pad(w1, ((0, in_p - in_f), (0, hid_p - hid))).astype(jnp.bfloat16)
    b1p = jnp.pad(b1, ((0, 0), (0, hid_p - hid))).astype(jnp.float32)
    w2p = jnp.pad(w2, ((0, hid_p - hid), (0, out_p - out_f))).astype(jnp.bfloat16)
    b2p = jnp.pad(b2, ((0, 0), (0, out_p - out_f))).astype(jnp.float32)

    grid = (b_pad // tm,)
    out = pl.pallas_call(
        _mlp_kernel,
        out_shape=jax.ShapeDtypeStruct((b_pad, out_p), jnp.float32),
        grid=grid,
        in_specs=[
            pl.BlockSpec((tm, in_p), lambda i: (i, 0)),      # x: tiled over batch
            pl.BlockSpec((in_p, hid_p), lambda i: (0, 0)),   # W1: VMEM-resident
            pl.BlockSpec((1, hid_p), lambda i: (0, 0)),      # b1: VMEM-resident row
            pl.BlockSpec((hid_p, out_p), lambda i: (0, 0)),  # W2: VMEM-resident
            pl.BlockSpec((1, out_p), lambda i: (0, 0)),      # b2: VMEM-resident row
        ],
        out_specs=pl.BlockSpec((tm, out_p), lambda i: (i, 0)),
        compiler_params=pltpu.CompilerParams(
            dimension_semantics=("parallel",),
        ),
    )(xb, w1p, b1p, w2p, b2p)

    return out[:batch, :out_f]


def init_params(key, in_features, hidden, out_features, dtype=jnp.float32):
    k1, k2, k3, k4 = jax.random.split(key, 4)
    # Deterministic synthetic init (roughly Kaiming-ish scaling); torch.nn.Linear
    # stores W as [out, in] -- here we keep [in, out] so the kernel does x @ W.
    w1 = jax.random.normal(k1, (in_features, hidden), dtype) * (1.0 / jnp.sqrt(in_features))
    b1 = jax.random.normal(k2, (1, hidden), dtype) * 0.01
    w2 = jax.random.normal(k3, (hidden, out_features), dtype) * (1.0 / jnp.sqrt(hidden))
    b2 = jax.random.normal(k4, (1, out_features), dtype) * 0.01
    return {"w1": w1, "b1": b1, "w2": w2, "b2": b2}


if __name__ == "__main__":
    key = jax.random.PRNGKey(0)
    kx, kp = jax.random.split(key)

    # Small-but-real sizes; deliberately non-128-aligned to exercise the padding path.
    batch, in_features, hidden, out_features = 200, 96, 192, 160
    x = jax.random.normal(kx, (batch, in_features), jnp.float32)
    params = init_params(kp, in_features, hidden, out_features)

    out = wrapped_model_forward(params, x, label=None)
    out = jax.block_until_ready(out)

    # Plain-JAX f32 reference of the same inner module. Kernel runs bf16 operands
    # with f32 accumulation, so tolerance is loosened accordingly.
    ref = jnp.maximum(x @ params["w1"] + params["b1"], 0.0) @ params["w2"] + params["b2"]
    assert out.shape == (batch, out_features)
    assert jnp.allclose(out, ref, atol=5e-2, rtol=5e-2), float(jnp.max(jnp.abs(out - ref)))

    print("KERNEL_OK")
</pallas_src>

<mosaic_0001>
module attributes {stable_mosaic.version = 11 : i64} {
  func.func @_mlp_kernel(%arg0: i32, %arg1: memref<128x128xbf16, #tpu.memory_space<vmem>>, %arg2: memref<128x256xbf16, #tpu.memory_space<vmem>>, %arg3: memref<1x256xf32, #tpu.memory_space<vmem>>, %arg4: memref<256x256xbf16, #tpu.memory_space<vmem>>, %arg5: memref<1x256xf32, #tpu.memory_space<vmem>>, %arg6: memref<128x256xf32, #tpu.memory_space<vmem>>) attributes {dimension_semantics = [#tpu.dimension_semantics<parallel>], iteration_bounds = array<i64: 2>, scalar_prefetch = 0 : i64, scratch_operands = 0 : i64, tpu.core_type = #tpu.core_type<tc>, window_params = [{transform_indices = @transform_0, window_bounds = array<i64: 128, 128>}, {pipeline_mode = #tpu.pipeline_mode<synchronous>, transform_indices = @transform_1, window_bounds = array<i64: 128, 256>}, {pipeline_mode = #tpu.pipeline_mode<synchronous>, transform_indices = @transform_2, window_bounds = array<i64: 1, 256>}, {pipeline_mode = #tpu.pipeline_mode<synchronous>, transform_indices = @transform_3, window_bounds = array<i64: 256, 256>}, {pipeline_mode = #tpu.pipeline_mode<synchronous>, transform_indices = @transform_4, window_bounds = array<i64: 1, 256>}, {transform_indices = @transform_5, window_bounds = array<i64: 128, 256>}]} {
    %c0 = arith.constant 0 : index
    %c0_0 = arith.constant 0 : index
    %0 = vector.load %arg1[%c0, %c0_0] : memref<128x128xbf16, #tpu.memory_space<vmem>>, vector<128x128xbf16>
    %c0_1 = arith.constant 0 : index
    %c0_2 = arith.constant 0 : index
    %1 = vector.load %arg2[%c0_1, %c0_2] : memref<128x256xbf16, #tpu.memory_space<vmem>>, vector<128x256xbf16>
    %cst = arith.constant dense<0.000000e+00> : vector<128x256xf32>
    %2 = tpu.matmul %0, %1, %cst {dimension_numbers = #tpu.dot_dimension_numbers<[1], [0], [0], [1], [0, 0, 1, 1], [], []>} : vector<128x128xbf16>, vector<128x256xbf16>, vector<128x256xf32> -> vector<128x256xf32>
    %c0_3 = arith.constant 0 : index
    %c0_4 = arith.constant 0 : index
    %3 = vector.load %arg3[%c0_3, %c0_4] : memref<1x256xf32, #tpu.memory_space<vmem>>, vector<1x256xf32>
    %4 = vector.broadcast %3 : vector<1x256xf32> to vector<128x256xf32>
    %5 = arith.addf %2, %4 : vector<128x256xf32>
    %cst_5 = arith.constant 0.000000e+00 : f32
    %6 = vector.broadcast %cst_5 : f32 to vector<128x256xf32>
    %7 = arith.maximumf %5, %6 : vector<128x256xf32>
    %8 = arith.truncf %7 : vector<128x256xf32> to vector<128x256xbf16>
    %c0_6 = arith.constant 0 : index
    %c0_7 = arith.constant 0 : index
    %9 = vector.load %arg4[%c0_6, %c0_7] : memref<256x256xbf16, #tpu.memory_space<vmem>>, vector<256x256xbf16>
    %cst_8 = arith.constant dense<0.000000e+00> : vector<128x256xf32>
    %10 = tpu.matmul %8, %9, %cst_8 {dimension_numbers = #tpu.dot_dimension_numbers<[1], [0], [0], [1], [0, 0, 1, 1], [], []>} : vector<128x256xbf16>, vector<256x256xbf16>, vector<128x256xf32> -> vector<128x256xf32>
    %c0_9 = arith.constant 0 : index
    %c0_10 = arith.constant 0 : index
    %11 = vector.load %arg5[%c0_9, %c0_10] : memref<1x256xf32, #tpu.memory_space<vmem>>, vector<1x256xf32>
    %12 = vector.broadcast %11 : vector<1x256xf32> to vector<128x256xf32>
    %13 = arith.addf %10, %12 : vector<128x256xf32>
    %c0_11 = arith.constant 0 : index
    %c0_12 = arith.constant 0 : index
    %14 = vector.load %arg6[%c0_11, %c0_12] : memref<128x256xf32, #tpu.memory_space<vmem>>, vector<128x256xf32>
    tpu.vector_store %arg6[%c0_11, %c0_12], %13 {strides = array<i32>} : memref<128x256xf32, #tpu.memory_space<vmem>>, vector<128x256xf32>,
    return
  }
  func.func @transform_0(%arg0: i32) -> (i32, i32) {
    %c0_i32 = arith.constant 0 : i32
    %c0_i32_0 = arith.constant 0 : i32
    return %arg0, %c0_i32 : i32, i32
  }
  func.func @transform_1(%arg0: i32) -> (i32, i32) {
    %c0_i32 = arith.constant 0 : i32
    %c0_i32_0 = arith.constant 0 : i32
    %c0_i32_1 = arith.constant 0 : i32
    return %c0_i32, %c0_i32_0 : i32, i32
  }
  func.func @transform_2(%arg0: i32) -> (i32, i32) {
    %c0_i32 = arith.constant 0 : i32
    %c0_i32_0 = arith.constant 0 : i32
    %c0_i32_1 = arith.constant 0 : i32
    return %c0_i32, %c0_i32_0 : i32, i32
  }
  func.func @transform_3(%arg0: i32) -> (i32, i32) {
    %c0_i32 = arith.constant 0 : i32
    %c0_i32_0 = arith.constant 0 : i32
    %c0_i32_1 = arith.constant 0 : i32
    return %c0_i32, %c0_i32_0 : i32, i32
  }
  func.func @transform_4(%arg0: i32) -> (i32, i32) {
    %c0_i32 = arith.constant 0 : i32
    %c0_i32_0 = arith.constant 0 : i32
    %c0_i32_1 = arith.constant 0 : i32
    return %c0_i32, %c0_i32_0 : i32, i32
  }
  func.func @transform_5(%arg0: i32) -> (i32, i32) {
    %c0_i32 = arith.constant 0 : i32
    %c0_i32_0 = arith.constant 0 : i32
    return %arg0, %c0_i32 : i32, i32
  }
}

</mosaic_0001>

<bundles_post_ra>
// kernel: tpu_custom_call.1
= control target key start
LH: loop header
LB: loop body
LE: loop exit
PB: predicated region body
PF: predicated region fallthrough
CT: control target
= control target key end

     0   :  { %10 = vsyncpa [#allocation3], 0  ;;  %s1851_s0 = inlined_call_operand.hbm [shape: bf16[256,128], index: 0, kind: input, shape index: {}]   ;;  %s1852_s1 = inlined_call_operand.hbm [shape: bf16[128,256], index: 1, kind: input, shape index: {}]   ;;  %s1853_s2 = inlined_call_operand.vmem [shape: f32[1,256], index: 2, kind: input, shape index: {}]   ;;  %s1854_s3 = inlined_call_operand.hbm [shape: bf16[256,256], index: 3, kind: input, shape index: {}]   ;;  %s1855_s4 = inlined_call_operand.vmem [shape: f32[1,256], index: 4, kind: input, shape index: {}]   ;;  %s1856_s5 = inlined_call_operand.hbm [shape: f32[256,256], index: 5, kind: output, shape index: {}]  }
   0x1   :  { %12 = vsyncpa [#allocation3 + $0x1], 0 }
   0x2   :  { %13 = vsyncpa [#allocation6], 0 }
   0x3   :  { %14 = vsyncpa [#allocation4], 0 }
   0x4   :  { %16 = vsyncpa [#allocation4 + $0x1], 0  ;;  %s1519_s18 = smov 0   ;;  %s1521_s19 = smov 0  }
   0x5   :  { %s1523_s20 = smov 0   ;;  %s1525_s21 = smov 0  }
   0x6 LB: > { %s1540_s22 = sadd.s32 4294967295, %s1476_s21   ;;  %s1064_s23 = sadd.s32 4294967294, %s1476_s21   ;;  %s1476_s21 = sphi %s1525_s21, %s1878_s21   ;;  %s1472_s20 = sphi %s1523_s20, %s1877_s20   ;;  %s1468_s19 = sphi %s1521_s19, %s1876_s19   ;;  %s1464_s18 = sphi %s1519_s18, %s1875_s18  }
   0x7   : > { %p42_p0 = scmp.ne.s32.totalorder %s1468_s19, %s1464_s18  ;;  %p1857_p1 = scmp.eq.s32.totalorder %s1540_s22, 0 }
   0x8   : > { %p156_p3 = scmp.eq.s32.totalorder %s1064_s23, 1  ;;  %p1065_p5 = scmp.ge.s32.totalorder %s1476_s21, 1 }
   0x9   : > { %p1549_p4 = por %p1857_p1, %p42_p0  ;;  %p163_p7 = scmp.lt.s32.totalorder %s1476_s21, 3 }
   0xa   : > { %p1554_p6 = por %p156_p3, %p42_p0  ;;  %s1478_s27 = smov [#allocation5]  }
   0xb   : > { %s1861_s24 = scalar_select %p1549_p4, 1, 0 }
   0xc   : > { %s1862_s25 = scalar_select %p1554_p6, 1, 0 }
   0xd   : > { %p1559_p8 = pnand %p1065_p5, %p163_p7  ;;  %s175_s28 = sshll.u32 %s1478_s27, 4  ;;  %s176_s28 = int_to_ptr.vmem [resolvable:$true] %s175_s28 }
   0xe   : > { %s1479_s30 = smov [#allocation7]   ;;  %s1339_s7 = scalar_lea.vmem %s176_s28, 2048 }
   0xf   : > { %s1863_s26 = scalar_select %p1559_p8, 1, 0 }
  0x10   : > { %p1186_p9 = pneg %p1559_p8  ;;  %s191_s6 = sshll.u32 %s1479_s30, 4  ;;  %s192_s6 = int_to_ptr.vmem [resolvable:$true] %s191_s6 }
  0x11   : > { %p1340_p13 = scmp.ne.s32.totalorder %s176_s28, %s1339_s7  ;;  %p1347_p5 = scmp.lt.s32.totalorder %s176_s28, %s176_s28 }
  0x12   : > { %p1568_p11 = pnand %p1186_p9, %p1857_p1  ;;  %p1348_p7 = scmp.lt.s32.totalorder %s1339_s7, %s1339_s7 }
  0x14   : > { %p1330_p12 = pneg %p1568_p11  ;;  %p1349_p10 = por %p1348_p7, %p1347_p5 }
  0x16   : > { %p1342_p0 = pnand %p1340_p13, %p1330_p12 }
  0x18   : > { %p1343_p3 = pneg %p1342_p0 }
  0x1a   : > { %p1350_p9 = pnand %p1349_p10, %p1343_p3 }
  0x1c   : > { %1353 = shalt.err (!%p1350_p9)
}
  0x1d   : > { %s1480_s8 = smov 128   ;;  %s1481_s9 = smov 8  }
  0x1e   : > { %1189 = dma.hbm_to_vmem [thread:$0]  (!%p1568_p11), %s1852_s1, 2048, %s176_s28, [#allocation6], %s1480_s8, %s1480_s8, %s1481_s9  }
  0x1f   : > { %s1365_s12 = scalar_lea.vmem %s192_s6, 4096  ;;  %p1373_p2 = scmp.lt.s32.totalorder %s192_s6, %s192_s6 }
  0x20   : > { %p1366_p1 = scmp.ne.s32.totalorder %s192_s6, %s1365_s12  ;;  %p1374_p6 = scmp.lt.s32.totalorder %s1365_s12, %s1365_s12 }
  0x22   : > { %p1368_p13 = pnand %p1366_p1, %p1330_p12  ;;  %p1375_p5 = por %p1374_p6, %p1373_p2 }
  0x24   : > { %p1369_p0 = pneg %p1368_p13 }
  0x26   : > { %p1376_p10 = pnand %p1375_p5, %p1369_p0 }
  0x28   : > { %1379 = shalt.err (!%p1376_p10)
}
  0x29   : > { %1192 = dma.hbm_to_vmem [thread:$0]  (!%p1568_p11), %s1854_s3, 4096, %s192_s6, [#allocation6], %s1480_s8, %s1480_s8, %s1481_s9  }
  0x2a   : > { %s1591_s15 = sadd.s32 1, %s1476_s21   ;;  %s29_s16 = sadd.s32 1, %s1472_s20 }
  0x2b   : > { %s26_s17 = ssub.s32 %s1476_s21, %s1591_s15  ;;  %p36_p1 = scmp.ne.s32.totalorder %s1472_s20, %s1468_s19 }
  0x2c   : > { %p27_p2 = scmp.eq.s32.totalorder %s26_s17, 0  ;;  %p37_p6 = scmp.eq.s32.totalorder %s1476_s21, 0 }
  0x2d   : > { %p1865_p12 = scmp.eq.s32.totalorder %s1540_s22, 1  ;;  %p1203_p7 = scmp.lt.s32.totalorder %s1476_s21, 2 }
  0x2e   : > { %s1607_s27 = scalar_select %p27_p2, %s1472_s20, %s29_s16  }
  0x2f   : > { %p1601_p3 = por %p1865_p12, %p36_p1  ;;  %p38_p9 = por %p37_p6, %p36_p1 }
  0x30   : > { %s208_s28 = sand.u32 1, %s1472_s20   ;;  %s1139_s30 = sshll.u32 %s1476_s21, 10 }
  0x31   : > { %s1866_s23 = scalar_select %p1601_p3, 1, 0 }
  0x32   : > { %s1069_s29 = sshll.u32 %s208_s28, 6  ;;  %s1614_s8 = scalar_lea.hbm %s1851_s0, %s1139_s30 }
  0x33   : > { %s212_s9 = scalar_lea.vmem [#allocation2], %s1069_s29  ;;  %p1618_p11 = pnand %p1203_p7, %p38_p9 }
  0x34   : > { %s219_s10 = sshll.u32 %s212_s9, 4  ;;  %s1622_s12 = scalar_lea.sflag [#allocation3], %s208_s28  ;;  %s1616_s10 = int_to_ptr.vmem [resolvable:$true] %s219_s10 }
  0x35   : > { %s1380_s13 = scalar_lea.hbm %s1614_s8, 1024  ;;  %p1382_p0 = pneg %p1618_p11 }
  0x36   : > { %p1381_p13 = scmp.ne.s32.totalorder %s1614_s8, %s1380_s13  ;;  %s1385_s17 = scalar_lea.hbm %s1851_s0, 2048 }
  0x37   : > { %p1386_p1 = scmp.lt.s32.totalorder %s1614_s8, %s1851_s0  ;;  %p1387_p2 = scmp.lt.s32.totalorder %s1385_s17, %s1380_s13 }
  0x38   : > { %p1383_p5 = pnand %p1382_p0, %p1381_p13 }
  0x39   : > { %p1388_p6 = por %p1387_p2, %p1386_p1 }
  0x3a   : > { %p1384_p10 = pneg %p1383_p5 }
  0x3c   : > { %p1389_p12 = pnand %p1388_p6, %p1384_p10 }
  0x3e   : > { %1392 = shalt.err (!%p1389_p12)
}
  0x3f   : > { %s1393_s28 = scalar_lea.vmem %s1616_s10, 1024  ;;  %s1482_s6 = smov [#allocation2]  }
  0x40   : > { %p1394_p7 = scmp.ne.s32.totalorder %s1616_s10, %s1393_s28  ;;  %s1398_s7 = sshll.u32 %s1482_s6, 4  ;;  %s1399_s7 = int_to_ptr.vmem [resolvable:$false] %s1398_s7 }
  0x41   : > { %s1400_s9 = scalar_lea.vmem %s1399_s7, 2048  ;;  %p1401_p5 = scmp.lt.s32.totalorder %s1616_s10, %s1399_s7 }
  0x42   : > { %p1396_p9 = pnand %p1394_p7, %p1382_p0  ;;  %p1402_p3 = scmp.lt.s32.totalorder %s1400_s9, %s1393_s28 }
  0x44   : > { %p1397_p13 = pneg %p1396_p9  ;;  %p1403_p4 = por %p1402_p3, %p1401_p5 }
  0x46   : > { %p1404_p8 = pnand %p1403_p4, %p1397_p13 }
  0x48   : > { %1407 = shalt.err (!%p1404_p8)
}
  0x49   : > { %s1483_s13 = smov 64   ;;  %s1484_s14 = smov 4  }
  0x4a   : > { %1196 = dma.hbm_to_vmem [thread:$0]  (!%p1618_p11), %s1614_s8, 1024, %s1616_s10, %s1622_s12, %s1483_s13, %s1483_s13, %s1484_s14  }
  0x4b   : > { %p1868_p0 = scmp.ne.s32.totalorder %s1863_s26, 0 }
  0x4c   : > { %s1646_s16 = sand.u32 (!%p1868_p0), 1, %s1468_s19   ;;  %p1869_p4 = scmp.ne.s32.totalorder (!%p1868_p0), %s1861_s24, 0 }
  0x4d   : > { %231 = sbr.rel (%p1868_p0) target bundleno = 596 (0x254), region = 40  ;;  %s1073_s17 = sshll.u32 (!%p1868_p0), %s1646_s16, 6 }
  0x4e   : > { %s234_s29 = scalar_lea.sflag (!%p1868_p0), [#allocation3], %s1646_s16  ;;  %s1650_s30 = scalar_lea.vmem (!%p1868_p0), [#allocation2], %s1073_s17 }
  0x52   : > { %1451 = dma.done.wait (%p1869_p4), %s234_s29, 1024  }
  0x53   : > { %1453 = vsyncadd (%p1869_p4), %s234_s29, 4294966272  ;;  %p1870_p8 = scmp.eq.s32.totalorder %s1540_s22, 0 }
  0x55   : > { %1455 = dma.done.wait (%p1870_p8), [#allocation6], 6144   ;;  %p1871_p3 = pmov %p1870_p8 }
  0x56   : > { %v1485_v0 = vmov 0   ;;  %v1248_v1 = vld [vmem:[#allocation5 + $0x74] ss:$8 sps:$4 sm:$0xff]   ;;  %v1250_v2 = vld [vmem:[#allocation5 + $0x70] ss:$8 sps:$4 sm:$0xff]   ;;  %v1272_v24 = vld [vmem:[%s1650_s30] sm:$0xff]   ;;  %v309_v57 = vlaneseq }
  0x57   : > { %1457 = vsyncadd (%p1871_p3), [#allocation6], 4294961152  ;;  %479 = vmatprep.mubr.bf16.mxu0 %v1485_v0  ;;  %447 = vmatprep.subr.bf16.mxu0 %v1248_v1  ;;  %v1251_v3 = vld [vmem:[#allocation5 + $0x64] ss:$8 sps:$4 sm:$0xff]   ;;  %v1253_v4 = vld [vmem:[#allocation5 + $0x60] ss:$8 sps:$4 sm:$0xff]  }
  0x58   : > { %448 = vmatpush1.bf16.msra.mxu0 %v1250_v2  ;;  %v1254_v5 = vld [vmem:[#allocation5 + $0x54] ss:$8 sps:$4 sm:$0xff]   ;;  %v1256_v6 = vld [vmem:[#allocation5 + $0x50] ss:$8 sps:$4 sm:$0xff]   ;;  %v1257_v7 = vld [vmem:[#allocation5 + $0x44] ss:$8 sps:$4 sm:$0xff]  }
  0x59   : > { %449 = vmatprep.subr.bf16.mxu0 %v1251_v3  ;;  %v1259_v8 = vld [vmem:[#allocation5 + $0x40] ss:$8 sps:$4 sm:$0xff]   ;;  %v1260_v9 = vld [vmem:[#allocation5 + $0x34] ss:$8 sps:$4 sm:$0xff]   ;;  %v1262_v10 = vld [vmem:[#allocation5 + $0x30] ss:$8 sps:$4 sm:$0xff]  }
  0x5a   : > { %v1263_v11 = vld [vmem:[#allocation5 + $0x24] ss:$8 sps:$4 sm:$0xff]   ;;  %v1265_v12 = vld [vmem:[#allocation5 + $0x20] ss:$8 sps:$4 sm:$0xff]   ;;  %v1266_v13 = vld [vmem:[#allocation5 + $0x14] ss:$8 sps:$4 sm:$0xff]  }
  0x5b   : > { %v1282_v14 = vld [vmem:[#allocation7 + $0x74] ss:$8 sps:$4 sm:$0xff]   ;;  %v1280_v15 = vld [vmem:[#allocation7 + $0x70] ss:$8 sps:$4 sm:$0xff]   ;;  %v1285_v16 = vld [vmem:[#allocation7 + $0x64] ss:$8 sps:$4 sm:$0xff]  }
  0x5c   : > { %450 = vmatpush1.bf16.msra.mxu0 %v1253_v4  ;;  %1142 = vmatprep.subr.bf16.mxu1 %v1282_v14  ;;  %v1268_v17 = vld [vmem:[#allocation5 + $0x10] ss:$8 sps:$4 sm:$0xff]   ;;  %v1269_v18 = vld [vmem:[#allocation5 + $0x4] ss:$8 sps:$4 sm:$0xff]   ;;  %v1283_v19 = vld [vmem:[#allocation7 + $0x60] ss:$8 sps:$4 sm:$0xff]  }
  0x5d   : > { %451 = vmatprep.subr.bf16.mxu0 %v1254_v5  ;;  %1158 = vmatpush1.bf16.msra.mxu1 %v1280_v15  ;;  %v1288_v20 = vld [vmem:[#allocation7 + $0x54] ss:$8 sps:$4 sm:$0xff]   ;;  %v1271_v21 = vld [vmem:[#allocation5] ss:$8 sps:$4 sm:$0xff]   ;;  %v1286_v22 = vld [vmem:[#allocation7 + $0x50] ss:$8 sps:$4 sm:$0xff]  }
  0x5e   : > { %1143 = vmatprep.subr.bf16.mxu1 %v1285_v16  ;;  %v1291_v23 = vld [vmem:[#allocation7 + $0x44] ss:$8 sps:$4 sm:$0xff]   ;;  %v1289_v25 = vld [vmem:[#allocation7 + $0x40] ss:$8 sps:$4 sm:$0xff]   ;;  %v1294_v26 = vld [vmem:[#allocation7 + $0x34] ss:$8 sps:$4 sm:$0xff]  }
  0x5f   : > { %v1292_v27 = vld [vmem:[#allocation7 + $0x30] ss:$8 sps:$4 sm:$0xff]   ;;  %v1297_v28 = vld [vmem:[#allocation7 + $0x24] ss:$8 sps:$4 sm:$0xff]   ;;  %v1295_v30 = vld [vmem:[#allocation7 + $0x20] ss:$8 sps:$4 sm:$0xff]  }
  0x60   : > { %452 = vmatpush1.bf16.msra.mxu0 %v1256_v6  ;;  %v1273_v29 = vld [vmem:[%s1650_s30 + $0x8] sm:$0xff]   ;;  %v1300_v31 = vld [vmem:[#allocation7 + $0x14] ss:$8 sps:$4 sm:$0xff]   ;;  %v1298_v32 = vld [vmem:[#allocation7 + $0x10] ss:$8 sps:$4 sm:$0xff]   ;;  %v1676_v58 = vshrl.u32 %v309_v57, 7 }
  0x61   : > { %453 = vmatprep.subr.bf16.mxu0 %v1257_v7  ;;  %1159 = vmatpush1.bf16.msra.mxu1 %v1283_v19  ;;  %v1303_v33 = vld [vmem:[#allocation7 + $0x4] ss:$8 sps:$4 sm:$0xff]   ;;  %v1274_v34 = vld [vmem:[%s1650_s30 + $0x10] sm:$0xff]   ;;  %v1301_v35 = vld [vmem:[#allocation7] ss:$8 sps:$4 sm:$0xff]   ;;  %s1076_s11 = sshll.u32 %s1646_s16, 8 }
  0x62   : > { %1144 = vmatprep.subr.bf16.mxu1 %v1288_v20  ;;  %v1306_v36 = vld [vmem:[#allocation7 + $0xf4] ss:$8 sps:$4 sm:$0xff]   ;;  %v1304_v37 = vld [vmem:[#allocation7 + $0xf0] ss:$8 sps:$4 sm:$0xff]   ;;  %v1309_v38 = vld [vmem:[#allocation7 + $0xe4] ss:$8 sps:$4 sm:$0xff]  }
  0x63   : > { %v1275_v39 = vld [vmem:[%s1650_s30 + $0x18] sm:$0xff]   ;;  %v1307_v40 = vld [vmem:[#allocation7 + $0xe0] ss:$8 sps:$4 sm:$0xff]   ;;  %v1315_v43 = vld [vmem:[#allocation7 + $0xc4] ss:$8 sps:$4 sm:$0xff]   ;;  %v315_v59 = vsub.s32 1, %v1676_v58 }
  0x64   : > { %454 = vmatpush1.bf16.msra.mxu0 %v1259_v8  ;;  %v1312_v41 = vld [vmem:[#allocation7 + $0xd4] ss:$8 sps:$4 sm:$0xff]   ;;  %v1310_v42 = vld [vmem:[#allocation7 + $0xd0] ss:$8 sps:$4 sm:$0xff]   ;;  %v1276_v44 = vld [vmem:[%s1650_s30 + $0x20] sm:$0xff]   ;;  %v311_v60 = vsub.s32 0, %v1676_v58 }
  0x65   : > { %455 = vmatprep.subr.bf16.mxu0 %v1260_v9  ;;  %1160 = vmatpush1.bf16.msra.mxu1 %v1286_v22  ;;  %v1313_v45 = vld [vmem:[#allocation7 + $0xc0] ss:$8 sps:$4 sm:$0xff]   ;;  %v1318_v46 = vld [vmem:[#allocation7 + $0xb4] ss:$8 sps:$4 sm:$0xff]   ;;  %v1316_v47 = vld [vmem:[#allocation7 + $0xb0] ss:$8 sps:$4 sm:$0xff]  }
  0x66   : > { %1145 = vmatprep.subr.bf16.mxu1 %v1291_v23  ;;  %v1277_v48 = vld [vmem:[%s1650_s30 + $0x28] sm:$0xff]   ;;  %v1278_v49 = vld [vmem:[%s1650_s30 + $0x30] sm:$0xff]   ;;  %v1279_v50 = vld [vmem:[%s1650_s30 + $0x38] sm:$0xff]   ;;  %s1736_s12 = scalar_lea.vmem [#allocation8], %s1076_s11  ;;  %s1141_s28 = sshll.u32 %s1540_s22, 12 }
  0x67   : > { %v1321_v51 = vld [vmem:[#allocation7 + $0xa4] ss:$8 sps:$4 sm:$0xff]   ;;  %v1319_v52 = vld [vmem:[#allocation7 + $0xa0] ss:$8 sps:$4 sm:$0xff]   ;;  %v1324_v53 = vld [vmem:[#allocation7 + $0x94] ss:$8 sps:$4 sm:$0xff]   ;;  %s1803_s13 = scalar_lea.hbm %s1856_s5, %s1141_s28 }
  0x68   : > { %456 = vmatpush1.bf16.msra.mxu0 %v1262_v10  ;;  %v1322_v54 = vld [vmem:[#allocation7 + $0x90] ss:$8 sps:$4 sm:$0xff]   ;;  %v1327_v55 = vld [vmem:[#allocation7 + $0x84] ss:$8 sps:$4 sm:$0xff]   ;;  %v1325_v56 = vld [vmem:[#allocation7 + $0x80] ss:$8 sps:$4 sm:$0xff]  }
  0x69   : > { %457 = vmatprep.subr.bf16.mxu0 %v1263_v11  ;;  %1161 = vmatpush1.bf16.msra.mxu1 %v1289_v25  ;;  %v307_v61 = vld [vmem:[%s1853_s2] sm:$0x3]  ;;  %s972_s6 = sshll.u32 %s1736_s12, 4  ;;  %s958_s22 = scalar_lea.sflag [#allocation4], %s1646_s16  ;;  %s1805_s6 = int_to_ptr.vmem [resolvable:$true] %s972_s6 }
  0x6a   : > { %1146 = vmatprep.subr.bf16.mxu1 %v1294_v26  ;;  %v1685_v63 = vrot.slane %v307_v61, %v315_v59  ;;  %s1408_s14 = scalar_lea.vmem %s1805_s6, 4096  ;;  %p1872_p10 = scmp.ne.s32.totalorder %s1866_s23, 0 }
  0x6b   : > { %p1409_p11 = scmp.ne.s32.totalorder %s1805_s6, %s1408_s14  ;;  %s1486_s17 = smov [#allocation8]  }
  0x6c   : > { %458 = vmatpush1.bf16.msra.mxu0 %v1265_v12  ;;  %s1412_s29 = sshll.u32 %s1486_s17, 4  ;;  %s1413_s29 = int_to_ptr.vmem [resolvable:$false] %s1412_s29 }
  0x6d   : > { %459 = vmatprep.subr.bf16.mxu0 %v1266_v13  ;;  %1162 = vmatpush1.bf16.msra.mxu1 %v1292_v27  ;;  %p1410_p1 = pnand %p1409_p11, %p1872_p10  ;;  %s1414_s30 = scalar_lea.vmem %s1413_s29, 8192 }
  0x6e   : > { %1147 = vmatprep.subr.bf16.mxu1 %v1297_v28  ;;  %p1415_p6 = scmp.lt.s32.totalorder %s1805_s6, %s1413_s29  ;;  %p1416_p12 = scmp.lt.s32.totalorder %s1414_s30, %s1408_s14 }
  0x6f   : > { %p1411_p2 = pneg %p1410_p1 }
  0x70   : > { %460 = vmatpush1.bf16.msra.mxu0 %v1268_v17  ;;  %p1417_p7 = por %p1416_p12, %p1415_p6 }
  0x71   : > { %461 = vmatprep.subr.bf16.mxu0 %v1269_v18  ;;  %1163 = vmatpush1.bf16.msra.mxu1 %v1295_v30 }
  0x72   : > { %1148 = vmatprep.subr.bf16.mxu1 %v1300_v31  ;;  %p1418_p9 = pnand %p1417_p7, %p1411_p2 }
  0x74   : > { %462 = vmatpush1.bf16.msra.mxu0 %v1271_v21 }
  0x75   : > { %812 = vmatprep.subr.bf16.mxu0 %v1282_v14  ;;  %1164 = vmatpush1.bf16.msra.mxu1 %v1298_v32 }
  0x76   : > { %1149 = vmatprep.subr.bf16.mxu1 %v1303_v33 }
  0x77   : > { %480 = vmatmul.mubr.bf16.vlgmr.msra.gmra.mxu0 %v1272_v24 }
  0x78   : > { %489 = vmatprep.mubr.bf16.mxu0 %v1485_v0  ;;  %813 = vmatpush1.bf16.msra.mxu0 %v1280_v15 }
  0x79   : > { %814 = vmatprep.subr.bf16.mxu0 %v1285_v16  ;;  %1165 = vmatpush1.bf16.msra.mxu1 %v1301_v35 }
  0x7a   : > { %1150 = vmatprep.subr.bf16.mxu1 %v1306_v36 }
  0x7c   : > { %815 = vmatpush1.bf16.msra.mxu0 %v1283_v19 }
  0x7d   : > { %816 = vmatprep.subr.bf16.mxu0 %v1288_v20  ;;  %1166 = vmatpush2.bf16.msra.mxu1 %v1304_v37 }
  0x7e   : > { %1151 = vmatprep.subr.bf16.mxu1 %v1309_v38 }
  0x7f   : > { %490 = vmatmul.mubr.bf16.gmra.mxu0 %v1273_v29 }
  0x80   : > { %499 = vmatprep.mubr.bf16.mxu0 %v1485_v0  ;;  %817 = vmatpush1.bf16.msra.mxu0 %v1286_v22 }
  0x81   : > { %818 = vmatprep.subr.bf16.mxu0 %v1291_v23  ;;  %1167 = vmatpush2.bf16.msra.mxu1 %v1307_v40 }
  0x82   : > { %1152 = vmatprep.subr.bf16.mxu1 %v1312_v41 }
  0x84   : > { %819 = vmatpush1.bf16.msra.mxu0 %v1289_v25 }
  0x85   : > { %820 = vmatprep.subr.bf16.mxu0 %v1294_v26  ;;  %1168 = vmatpush2.bf16.msra.mxu1 %v1310_v42 }
  0x86   : > { %1153 = vmatprep.subr.bf16.mxu1 %v1315_v43 }
  0x87   : > { %500 = vmatmul.mubr.bf16.gmra.mxu0 %v1274_v34 }
  0x88   : > { %509 = vmatprep.mubr.bf16.mxu0 %v1485_v0  ;;  %821 = vmatpush1.bf16.msra.mxu0 %v1292_v27 }
  0x89   : > { %822 = vmatprep.subr.bf16.mxu0 %v1297_v28  ;;  %1169 = vmatpush2.bf16.msra.mxu1 %v1313_v45 }
  0x8a   : > { %1154 = vmatprep.subr.bf16.mxu1 %v1318_v46 }
  0x8c   : > { %823 = vmatpush1.bf16.msra.mxu0 %v1295_v30 }
  0x8d   : > { %824 = vmatprep.subr.bf16.mxu0 %v1300_v31  ;;  %1170 = vmatpush2.bf16.msra.mxu1 %v1316_v47 }
  0x8e   : > { %1155 = vmatprep.subr.bf16.mxu1 %v1321_v51 }
  0x8f   : > { %510 = vmatmul.mubr.bf16.gmra.mxu0 %v1275_v39 }
  0x90   : > { %519 = vmatprep.mubr.bf16.mxu0 %v1485_v0  ;;  %825 = vmatpush1.bf16.msra.mxu0 %v1298_v32 }
  0x91   : > { %826 = vmatprep.subr.bf16.mxu0 %v1303_v33  ;;  %1171 = vmatpush2.bf16.msra.mxu1 %v1319_v52 }
  0x92   : > { %1156 = vmatprep.subr.bf16.mxu1 %v1324_v53 }
  0x94   : > { %827 = vmatpush1.bf16.msra.mxu0 %v1301_v35 }
  0x95   : > { %828 = vmatprep.subr.bf16.mxu0 %v1306_v36  ;;  %1172 = vmatpush2.bf16.msra.mxu1 %v1322_v54 }
  0x96   : > { %1157 = vmatprep.subr.bf16.mxu1 %v1327_v55 }
  0x97   : > { %520 = vmatmul.mubr.bf16.gmra.mxu0 %v1276_v44 }
  0x98   : > { %529 = vmatprep.mubr.bf16.mxu0 %v1485_v0  ;;  %829 = vmatpush2.bf16.msra.mxu0 %v1304_v37 }
  0x99   : > { %830 = vmatprep.subr.bf16.mxu0 %v1309_v38  ;;  %1173 = vmatpush2.bf16.msra.mxu1 %v1325_v56 }
  0x9c   : > { %831 = vmatpush2.bf16.msra.mxu0 %v1307_v40 }
  0x9d   : > { %832 = vmatprep.subr.bf16.mxu0 %v1312_v41 }
  0x9f   : > { %530 = vmatmul.mubr.bf16.gmra.mxu0 %v1277_v48 }
  0xa0   : > { %539 = vmatprep.mubr.bf16.mxu0 %v1485_v0  ;;  %833 = vmatpush2.bf16.msra.mxu0 %v1310_v42 }
  0xa1   : > { %834 = vmatprep.subr.bf16.mxu0 %v1315_v43 }
  0xa4   : > { %835 = vmatpush2.bf16.msra.mxu0 %v1313_v45 }
  0xa5   : > { %836 = vmatprep.subr.bf16.mxu0 %v1318_v46 }
  0xa7   : > { %540 = vmatmul.mubr.bf16.gmra.mxu0 %v1278_v49 }
  0xa8   : > { %549 = vmatprep.mubr.bf16.mxu0 %v1485_v0  ;;  %837 = vmatpush2.bf16.msra.mxu0 %v1316_v47  ;;  %v1689_v0 = vrot.slane %v307_v61, %v311_v60 }
  0xa9   : > { %838 = vmatprep.subr.bf16.mxu0 %v1321_v51 }
  0xac   : > { %839 = vmatpush2.bf16.msra.mxu0 %v1319_v52 }
  0xad   : > { %840 = vmatprep.subr.bf16.mxu0 %v1324_v53 }
  0xaf   : > { %550 = vmatmul.mubr.bf16.gmra.mxu0 %v1279_v50 }
  0xb0   : > { %841 = vmatpush2.bf16.msra.mxu0 %v1322_v54 }
  0xb1   : > { %842 = vmatprep.subr.bf16.mxu0 %v1327_v55 }
  0xb4   : > { %843 = vmatpush2.bf16.msra.mxu0 %v1325_v56 }
 0x137   : > { %v481_v62 = vpop.f32.mrf.mxu0 }
 0x138   : > { %v482_v5 = vadd.f32 %v481_v62, %v1689_v0 }
 0x139   : > { %v483_v1 = vpop.f32.mrf.mxu0 }
 0x13a   : > { %v484_v3 = vadd.f32 %v483_v1, %v1685_v63  ;;  %v560_v12 = vmax.f32 %v482_v5, 0.0 }
 0x13b   : > { %v485_v2 = vpop.f32.mrf.mxu0 }
 0x13c   : > { %v486_v4 = vadd.f32 %v485_v2, %v1689_v0  ;;  %v561_v10 = vmax.f32 %v484_v3, 0.0 }
 0x13d   : > { %v487_v6 = vpop.f32.mrf.mxu0 }
 0x13e   : > { %v488_v7 = vadd.f32 %v487_v6, %v1685_v63  ;;  %v562_v8 = vmax.f32 %v486_v4, 0.0 }
 0x13f   : > { %v491_v9 = vpop.f32.mrf.mxu0 }
 0x140   : > { %v563_v11 = vmax.f32 %v488_v7, 0.0  ;;  %v592_v15 = vpack.c.bf16 %v562_v8, %v560_v12  ;;  %v492_v19 = vadd.f32 %v491_v9, %v1689_v0 }
 0x141   : > { %v493_v13 = vpop.f32.mrf.mxu0 }
 0x142   : > { %v593_v14 = vpack.c.bf16 %v563_v11, %v561_v10  ;;  %v494_v17 = vadd.f32 %v493_v13, %v1685_v63  ;;  %v564_v26 = vmax.f32 %v492_v19, 0.0 }
 0x143   : > { %v495_v16 = vpop.f32.mrf.mxu0 }
 0x144   : > { %v496_v18 = vadd.f32 %v495_v16, %v1689_v0  ;;  %844 = vmatprep.mubr.bf16.mxu0 %v593_v14  ;;  %v565_v24 = vmax.f32 %v494_v17, 0.0 }
 0x145   : > { %v497_v20 = vpop.f32.mrf.mxu0  ;;  %845 = vmatmul.mubr.bf16.vlgmr.msra.gmra.mxu0 %v592_v15 }
 0x146   : > { %v498_v21 = vadd.f32 %v497_v20, %v1685_v63  ;;  %v566_v22 = vmax.f32 %v496_v18, 0.0 }
 0x147   : > { %v501_v23 = vpop.f32.mrf.mxu0 }
 0x148   : > { %v567_v25 = vmax.f32 %v498_v21, 0.0  ;;  %v594_v29 = vpack.c.bf16 %v566_v22, %v564_v26  ;;  %v502_v33 = vadd.f32 %v501_v23, %v1689_v0 }
 0x149   : > { %v503_v27 = vpop.f32.mrf.mxu0 }
 0x14a   : > { %v595_v28 = vpack.c.bf16 %v567_v25, %v565_v24  ;;  %v504_v31 = vadd.f32 %v503_v27, %v1685_v63  ;;  %v568_v40 = vmax.f32 %v502_v33, 0.0 }
 0x14b   : > { %v505_v30 = vpop.f32.mrf.mxu0 }
 0x14c   : > { %v506_v32 = vadd.f32 %v505_v30, %v1689_v0  ;;  %854 = vmatprep.mubr.bf16.mxu0 %v595_v28  ;;  %v569_v38 = vmax.f32 %v504_v31, 0.0 }
 0x14d   : > { %v507_v34 = vpop.f32.mrf.mxu0  ;;  %855 = vmatmul.mubr.bf16.gmra.mxu0 %v594_v29 }
 0x14e   : > { %v508_v35 = vadd.f32 %v507_v34, %v1685_v63  ;;  %v570_v36 = vmax.f32 %v506_v32, 0.0 }
 0x14f   : > { %v511_v37 = vpop.f32.mrf.mxu0 }
 0x150   : > { %v571_v39 = vmax.f32 %v508_v35, 0.0  ;;  %v596_v43 = vpack.c.bf16 %v570_v36, %v568_v40  ;;  %v512_v47 = vadd.f32 %v511_v37, %v1689_v0 }
 0x151   : > { %v513_v41 = vpop.f32.mrf.mxu0 }
 0x152   : > { %v597_v42 = vpack.c.bf16 %v571_v39, %v569_v38  ;;  %v514_v45 = vadd.f32 %v513_v41, %v1685_v63  ;;  %v572_v54 = vmax.f32 %v512_v47, 0.0 }
 0x153   : > { %v515_v44 = vpop.f32.mrf.mxu0 }
 0x154   : > { %v516_v46 = vadd.f32 %v515_v44, %v1689_v0  ;;  %864 = vmatprep.mubr.bf16.mxu1 %v597_v42  ;;  %v573_v52 = vmax.f32 %v514_v45, 0.0 }
 0x155   : > { %v517_v48 = vpop.f32.mrf.mxu0  ;;  %865 = vmatmul.mubr.bf16.vlgmr.msra.gmra.mxu1 %v596_v43 }
 0x156   : > { %v518_v49 = vadd.f32 %v517_v48, %v1685_v63  ;;  %v574_v50 = vmax.f32 %v516_v46, 0.0 }
 0x157   : > { %v521_v51 = vpop.f32.mrf.mxu0 }
 0x158   : > { %v575_v53 = vmax.f32 %v518_v49, 0.0  ;;  %v598_v57 = vpack.c.bf16 %v574_v50, %v572_v54  ;;  %v522_v2 = vadd.f32 %v521_v51, %v1689_v0 }
 0x159   : > { %v523_v55 = vpop.f32.mrf.mxu0 }
 0x15a   : > { %v599_v56 = vpack.c.bf16 %v575_v53, %v573_v52  ;;  %v524_v62 = vadd.f32 %v523_v55, %v1685_v63  ;;  %v576_v9 = vmax.f32 %v522_v2, 0.0  ;;  %v640_v53 = vld [vmem:[%s1855_s4] sm:$0x3] }
 0x15b   : > { %v525_v61 = vpop.f32.mrf.mxu0 }
 0x15c   : > { %v526_v1 = vadd.f32 %v525_v61, %v1689_v0  ;;  %874 = vmatprep.mubr.bf16.mxu1 %v599_v56  ;;  %v577_v7 = vmax.f32 %v524_v62, 0.0 }
 0x15d   : > { %v527_v3 = vpop.f32.mrf.mxu0  ;;  %875 = vmatmul.mubr.bf16.gmra.mxu1 %v598_v57 }
 0x15e   : > { %v528_v4 = vadd.f32 %v527_v3, %v1685_v63  ;;  %v578_v5 = vmax.f32 %v526_v1, 0.0 }
 0x15f   : > { %v531_v6 = vpop.f32.mrf.mxu0 }
 0x160   : > { %v579_v8 = vmax.f32 %v528_v4, 0.0  ;;  %v600_v12 = vpack.c.bf16 %v578_v5, %v576_v9  ;;  %v532_v16 = vadd.f32 %v531_v6, %v1689_v0 }
 0x161   : > { %v533_v10 = vpop.f32.mrf.mxu0 }
 0x162   : > { %v601_v11 = vpack.c.bf16 %v579_v8, %v577_v7  ;;  %v534_v14 = vadd.f32 %v533_v10, %v1685_v63  ;;  %v580_v23 = vmax.f32 %v532_v16, 0.0 }
 0x163   : > { %v535_v13 = vpop.f32.mrf.mxu0 }
 0x164   : > { %v536_v15 = vadd.f32 %v535_v13, %v1689_v0  ;;  %884 = vmatprep.mubr.bf16.mxu1 %v601_v11  ;;  %v581_v21 = vmax.f32 %v534_v14, 0.0 }
 0x165   : > { %v537_v17 = vpop.f32.mrf.mxu0  ;;  %885 = vmatmul.mubr.bf16.gmra.mxu1 %v600_v12 }
 0x166   : > { %v538_v18 = vadd.f32 %v537_v17, %v1685_v63  ;;  %v582_v19 = vmax.f32 %v536_v15, 0.0 }
 0x167   : > { %v541_v20 = vpop.f32.mrf.mxu0 }
 0x168   : > { %v583_v22 = vmax.f32 %v538_v18, 0.0  ;;  %v602_v26 = vpack.c.bf16 %v582_v19, %v580_v23  ;;  %v542_v30 = vadd.f32 %v541_v20, %v1689_v0 }
 0x169   : > { %v543_v24 = vpop.f32.mrf.mxu0 }
 0x16a   : > { %v603_v25 = vpack.c.bf16 %v583_v22, %v581_v21  ;;  %v544_v28 = vadd.f32 %v543_v24, %v1685_v63  ;;  %v584_v37 = vmax.f32 %v542_v30, 0.0 }
 0x16b   : > { %v545_v27 = vpop.f32.mrf.mxu0 }
 0x16c   : > { %v546_v29 = vadd.f32 %v545_v27, %v1689_v0  ;;  %894 = vmatprep.mubr.bf16.mxu1 %v603_v25  ;;  %v585_v35 = vmax.f32 %v544_v28, 0.0 }
 0x16d   : > { %v547_v31 = vpop.f32.mrf.mxu0  ;;  %895 = vmatmul.mubr.bf16.gmra.mxu1 %v602_v26 }
 0x16e   : > { %v548_v32 = vadd.f32 %v547_v31, %v1685_v63  ;;  %v586_v33 = vmax.f32 %v546_v29, 0.0 }
 0x16f   : > { %v551_v34 = vpop.f32.mrf.mxu0 }
 0x170   : > { %v587_v36 = vmax.f32 %v548_v32, 0.0  ;;  %v604_v40 = vpack.c.bf16 %v586_v33, %v584_v37  ;;  %v552_v44 = vadd.f32 %v551_v34, %v1689_v0 }
 0x171   : > { %v553_v38 = vpop.f32.mrf.mxu0 }
 0x172   : > { %v605_v39 = vpack.c.bf16 %v587_v36, %v585_v35  ;;  %v554_v42 = vadd.f32 %v553_v38, %v1685_v63  ;;  %v588_v50 = vmax.f32 %v552_v44, 0.0 }
 0x173   : > { %v555_v41 = vpop.f32.mrf.mxu0 }
 0x174   : > { %v556_v43 = vadd.f32 %v555_v41, %v1689_v0  ;;  %904 = vmatprep.mubr.bf16.mxu1 %v605_v39  ;;  %v589_v48 = vmax.f32 %v554_v42, 0.0  ;;  %v1729_v0 = vrot.slane %v640_v53, %v311_v60 }
 0x175   : > { %v557_v45 = vpop.f32.mrf.mxu0  ;;  %905 = vmatmul.mubr.bf16.gmra.mxu1 %v604_v40 }
 0x176   : > { %v558_v46 = vadd.f32 %v557_v45, %v1685_v63  ;;  %v590_v47 = vmax.f32 %v556_v43, 0.0  ;;  %v1733_v63 = vrot.slane %v640_v53, %v315_v59 }
 0x178   : > { %v591_v49 = vmax.f32 %v558_v46, 0.0  ;;  %v606_v52 = vpack.c.bf16 %v590_v47, %v588_v50 }
 0x17a   : > { %v607_v51 = vpack.c.bf16 %v591_v49, %v589_v48 }
 0x17c   : > { %914 = vmatprep.mubr.bf16.mxu1 %v607_v51 }
 0x17d   : > { %915 = vmatmul.mubr.bf16.gmra.mxu1 %v606_v52 }
 0x205   : > { %v846_v54 = vpop.f32.mrf.mxu0 }
 0x206   : > { %v847_v55 = vadd.f32 %v846_v54, %v1729_v0 }
 0x207   : > { %v848_v56 = vpop.f32.mrf.mxu0 }
 0x208   : > { %925 = vst [vmem:[%s1736_s12] sm:$0xff] %v847_v55  ;;  %v849_v60 = vadd.f32 %v848_v56, %v1733_v63 }
 0x209   : > { %v850_v57 = vpop.f32.mrf.mxu0 }
 0x20a   : > { %926 = vst [vmem:[%s1736_s12 + $0x8] sm:$0xff] %v849_v60  ;;  %v851_v58 = vadd.f32 %v850_v57, %v1729_v0 }
 0x20b   : > { %v852_v59 = vpop.f32.mrf.mxu0 }
 0x20c   : > { %927 = vst [vmem:[%s1736_s12 + $0x10] sm:$0xff] %v851_v58  ;;  %v853_v61 = vadd.f32 %v852_v59, %v1733_v63 }
 0x20d   : > { %v856_v62 = vpop.f32.mrf.mxu0 }
 0x20e   : > { %928 = vst [vmem:[%s1736_s12 + $0x18] sm:$0xff] %v853_v61  ;;  %v857_v1 = vadd.f32 %v856_v62, %v1729_v0 }
 0x20f   : > { %v858_v2 = vpop.f32.mrf.mxu0 }
 0x210   : > { %929 = vst [vmem:[%s1736_s12 + $0x20] sm:$0xff] %v857_v1  ;;  %v859_v3 = vadd.f32 %v858_v2, %v1733_v63 }
 0x211   : > { %v860_v4 = vpop.f32.mrf.mxu0 }
 0x212   : > { %930 = vst [vmem:[%s1736_s12 + $0x28] sm:$0xff] %v859_v3  ;;  %v861_v5 = vadd.f32 %v860_v4, %v1729_v0 }
 0x213   : > { %v862_v6 = vpop.f32.mrf.mxu0 }
 0x214   : > { %931 = vst [vmem:[%s1736_s12 + $0x30] sm:$0xff] %v861_v5  ;;  %v863_v7 = vadd.f32 %v862_v6, %v1733_v63 }
 0x215   : > { %v866_v8 = vpop.f32.mrf.mxu1 }
 0x216   : > { %932 = vst [vmem:[%s1736_s12 + $0x38] sm:$0xff] %v863_v7  ;;  %v867_v9 = vadd.f32 %v866_v8, %v1729_v0 }
 0x217   : > { %v868_v10 = vpop.f32.mrf.mxu1 }
 0x218   : > { %933 = vst [vmem:[%s1736_s12 + $0x40] sm:$0xff] %v867_v9  ;;  %v869_v11 = vadd.f32 %v868_v10, %v1733_v63 }
 0x219   : > { %v870_v12 = vpop.f32.mrf.mxu1 }
 0x21a   : > { %934 = vst [vmem:[%s1736_s12 + $0x48] sm:$0xff] %v869_v11  ;;  %v871_v13 = vadd.f32 %v870_v12, %v1729_v0 }
 0x21b   : > { %v872_v14 = vpop.f32.mrf.mxu1 }
 0x21c   : > { %935 = vst [vmem:[%s1736_s12 + $0x50] sm:$0xff] %v871_v13  ;;  %v873_v15 = vadd.f32 %v872_v14, %v1733_v63 }
 0x21d   : > { %v876_v16 = vpop.f32.mrf.mxu1 }
 0x21e   : > { %936 = vst [vmem:[%s1736_s12 + $0x58] sm:$0xff] %v873_v15  ;;  %v877_v17 = vadd.f32 %v876_v16, %v1729_v0 }
 0x21f   : > { %v878_v18 = vpop.f32.mrf.mxu1 }
 0x220   : > { %937 = vst [vmem:[%s1736_s12 + $0x60] sm:$0xff] %v877_v17  ;;  %v879_v19 = vadd.f32 %v878_v18, %v1733_v63 }
 0x221   : > { %v880_v20 = vpop.f32.mrf.mxu1 }
 0x222   : > { %938 = vst [vmem:[%s1736_s12 + $0x68] sm:$0xff] %v879_v19  ;;  %v881_v21 = vadd.f32 %v880_v20, %v1729_v0 }
 0x223   : > { %v882_v22 = vpop.f32.mrf.mxu1 }
 0x224   : > { %939 = vst [vmem:[%s1736_s12 + $0x70] sm:$0xff] %v881_v21  ;;  %v883_v23 = vadd.f32 %v882_v22, %v1733_v63 }
 0x225   : > { %v886_v24 = vpop.f32.mrf.mxu1 }
 0x226   : > { %940 = vst [vmem:[%s1736_s12 + $0x78] sm:$0xff] %v883_v23  ;;  %v887_v25 = vadd.f32 %v886_v24, %v1729_v0 }
 0x227   : > { %v888_v26 = vpop.f32.mrf.mxu1 }
 0x228   : > { %941 = vst [vmem:[%s1736_s12 + $0x80] sm:$0xff] %v887_v25  ;;  %v889_v27 = vadd.f32 %v888_v26, %v1733_v63 }
 0x229   : > { %v890_v28 = vpop.f32.mrf.mxu1 }
 0x22a   : > { %942 = vst [vmem:[%s1736_s12 + $0x88] sm:$0xff] %v889_v27  ;;  %v891_v29 = vadd.f32 %v890_v28, %v1729_v0 }
 0x22b   : > { %v892_v30 = vpop.f32.mrf.mxu1 }
 0x22c   : > { %943 = vst [vmem:[%s1736_s12 + $0x90] sm:$0xff] %v891_v29  ;;  %v893_v31 = vadd.f32 %v892_v30, %v1733_v63 }
 0x22d   : > { %v896_v32 = vpop.f32.mrf.mxu1 }
 0x22e   : > { %944 = vst [vmem:[%s1736_s12 + $0x98] sm:$0xff] %v893_v31  ;;  %v897_v33 = vadd.f32 %v896_v32, %v1729_v0 }
 0x22f   : > { %v898_v34 = vpop.f32.mrf.mxu1 }
 0x230   : > { %945 = vst [vmem:[%s1736_s12 + $0xa0] sm:$0xff] %v897_v33  ;;  %v899_v35 = vadd.f32 %v898_v34, %v1733_v63 }
 0x231   : > { %v900_v36 = vpop.f32.mrf.mxu1 }
 0x232   : > { %946 = vst [vmem:[%s1736_s12 + $0xa8] sm:$0xff] %v899_v35  ;;  %v901_v37 = vadd.f32 %v900_v36, %v1729_v0 }
 0x233   : > { %v902_v38 = vpop.f32.mrf.mxu1 }
 0x234   : > { %947 = vst [vmem:[%s1736_s12 + $0xb0] sm:$0xff] %v901_v37  ;;  %v903_v39 = vadd.f32 %v902_v38, %v1733_v63 }
 0x235   : > { %v906_v40 = vpop.f32.mrf.mxu1 }
 0x236   : > { %948 = vst [vmem:[%s1736_s12 + $0xb8] sm:$0xff] %v903_v39  ;;  %v907_v41 = vadd.f32 %v906_v40, %v1729_v0 }
 0x237   : > { %v908_v42 = vpop.f32.mrf.mxu1 }
 0x238   : > { %949 = vst [vmem:[%s1736_s12 + $0xc0] sm:$0xff] %v907_v41  ;;  %v909_v43 = vadd.f32 %v908_v42, %v1733_v63 }
 0x239   : > { %v910_v44 = vpop.f32.mrf.mxu1 }
 0x23a   : > { %950 = vst [vmem:[%s1736_s12 + $0xc8] sm:$0xff] %v909_v43  ;;  %v911_v45 = vadd.f32 %v910_v44, %v1729_v0 }
 0x23b   : > { %v912_v46 = vpop.f32.mrf.mxu1 }
 0x23c   : > { %951 = vst [vmem:[%s1736_s12 + $0xd0] sm:$0xff] %v911_v45  ;;  %v913_v47 = vadd.f32 %v912_v46, %v1733_v63 }
 0x23d   : > { %v916_v48 = vpop.f32.mrf.mxu1 }
 0x23e   : > { %952 = vst [vmem:[%s1736_s12 + $0xd8] sm:$0xff] %v913_v47  ;;  %v917_v49 = vadd.f32 %v916_v48, %v1729_v0 }
 0x23f   : > { %v918_v50 = vpop.f32.mrf.mxu1 }
 0x240   : > { %953 = vst [vmem:[%s1736_s12 + $0xe0] sm:$0xff] %v917_v49  ;;  %v919_v51 = vadd.f32 %v918_v50, %v1733_v63 }
 0x241   : > { %v920_v52 = vpop.f32.mrf.mxu1 }
 0x242   : > { %954 = vst [vmem:[%s1736_s12 + $0xe8] sm:$0xff] %v919_v51  ;;  %v921_v53 = vadd.f32 %v920_v52, %v1729_v0 }
 0x243   : > { %v922_v54 = vpop.f32.mrf.mxu1 }
 0x244   : > { %955 = vst [vmem:[%s1736_s12 + $0xf0] sm:$0xff] %v921_v53  ;;  %v923_v55 = vadd.f32 %v922_v54, %v1733_v63 }
 0x246   : > { %956 = vst [vmem:[%s1736_s12 + $0xf8] sm:$0xff] %v923_v55 }
 0x247   : > { %1421 = shalt.err (!%p1418_p9)
}
 0x248   : > { %s1422_s24 = scalar_lea.hbm %s1803_s13, 4096  ;;  %s1426_s10 = scalar_lea.hbm %s1856_s5, 8192 }
 0x249   : > { %p1423_p13 = scmp.ne.s32.totalorder %s1803_s13, %s1422_s24  ;;  %p1427_p4 = scmp.lt.s32.totalorder %s1803_s13, %s1856_s5 }
 0x24a   : > { %p1428_p8 = scmp.lt.s32.totalorder %s1426_s10, %s1422_s24 }
 0x24b   : > { %p1424_p5 = pnand %p1423_p13, %p1872_p10 }
 0x24c   : > { %p1429_p3 = por %p1428_p8, %p1427_p4 }
 0x24d   : > { %p1425_p0 = pneg %p1424_p5 }
 0x24f   : > { %p1430_p11 = pnand %p1429_p3, %p1425_p0 }
 0x251   : > { %1433 = shalt.err (!%p1430_p11)
}
 0x252   : > { %s1487_s28 = smov 256   ;;  %s1488_s7 = smov 16  }
 0x253   : > { %1184 = dma.vmem_to_hbm [thread:$0]  (%p1872_p10), %s1805_s6, 4096, %s1803_s13, %s958_s22, %s1487_s28, %s1487_s28, %s1488_s7  }
 0x254 PF: > { %s987_s9 = sand.u32 1, %s1464_s18   ;;  %p1873_p1 = scmp.ne.s32.totalorder %s1862_s25, 0 }
 0x255   : > { %p1874_p2 = scmp.ge.s32.totalorder %s1476_s21, 2  ;;  %s988_s14 = scalar_lea.sflag [#allocation4], %s987_s9 }
 0x257   : > { %p1198_p6 = pnand %p1874_p2, %p1873_p1 }
 0x259   : > { %p1199_p12 = pneg %p1198_p6 }
 0x25b   : > { %1459 = dma.done.wait (%p1199_p12), %s988_s14, 4096  }
 0x25c   : > { %1461 = vsyncadd (%p1199_p12), %s988_s14, 4294963200  ;;  %p19_p7 = scmp.ge.s32.totalorder %s1591_s15, 4   ;;  %s1875_s18 = smov %s1468_s19 }
 0x25d   : > { %s1876_s19 = smov %s1472_s20  ;;  %s1877_s20 = smov %s1607_s27 }
 0x25e   : > { %s1878_s21 = smov %s1591_s15  ;;  %21 = sbr.rel (!%p19_p7) target bundleno = 6 (0x6), region = 93 }
 0x263   :  { %993 = vsyncpa [#allocation3], 1 }
 0x264   :  { %995 = vsyncpa [#allocation3 + $0x1], 1 }
 0x265   :  { %996 = vsyncpa [#allocation6], 1 }
 0x266   :  { %997 = vsyncpa [#allocation4], 1 }
 0x267   :  { %999 = vsyncpa [#allocation4 + $0x1], 1 }

</bundles_post_ra>
